<compile_context>
chip_gen: v6e
topology: v6e:2x2x1
jax: 0.10.0
libtpu: 0.0.40
codegen_flags: <defaults>
</compile_context>

<pallas_src>
import functools

import jax
import jax.numpy as jnp
from jax.experimental import pallas as pl
from jax.experimental.pallas import tpu as pltpu


# ----------------------------------------------------------------------------
# Pallas kernels: fused (windows @ W) + bias
# ----------------------------------------------------------------------------
def _proj_kernel(x_ref, w_ref, b_ref, o_ref):
    # Single-K-block fast path (no accumulator scratch).
    # x_ref: (tm, K) f32 -> cast to bf16 in-kernel (VPU slot has slack)
    # w_ref: (K, tn) bf16 ; b_ref: (1, tn) f32 ; o_ref: (tm, tn) out_dtype
    acc = jnp.dot(x_ref[...].astype(jnp.bfloat16), w_ref[...],
                  preferred_element_type=jnp.float32)
    o_ref[...] = (acc + b_ref[...]).astype(o_ref.dtype)


def _proj_kernel_ktiled(x_ref, w_ref, b_ref, o_ref, acc_ref):
    # K-tiled path (pattern P3): f32 accumulator, zeroed at k==0, bias added
    # and stored (with the only dtype cast) at the last k step.
    k = pl.program_id(2)

    @pl.when(k == 0)
    def _():
        acc_ref[...] = jnp.zeros_like(acc_ref)

    acc_ref[...] += jnp.dot(x_ref[...].astype(jnp.bfloat16), w_ref[...],
                            preferred_element_type=jnp.float32)

    @pl.when(k == pl.num_programs(2) - 1)
    def _():
        o_ref[...] = (acc_ref[...] + b_ref[...]).astype(o_ref.dtype)


# ----------------------------------------------------------------------------
# Wrapper around pallas_call
# ----------------------------------------------------------------------------
def conv1d_proj_pallas(x_win, w_flat, bias2d, *, tm=512, tk=None,
                       out_dtype=jnp.bfloat16):
    """x_win: (M, K) f32, w_flat: (K, N) bf16, bias2d: (1, N) f32 -> (M, N)."""
    M, K = x_win.shape
    Kw, N = w_flat.shape
    assert K == Kw, "weight / activation K mismatch"
    assert N % 128 == 0, "output width must be lane-aligned"

    # --- M tiling: pad rows to a sublane-aligned multiple of the M tile. ----
    m_pad = max(8, ((M + 7) // 8) * 8)
    tm_eff = min(tm, m_pad)
    if m_pad % tm_eff != 0:
        m_pad = ((m_pad + tm_eff - 1) // tm_eff) * tm_eff
    if m_pad != M:
        x_win = jnp.pad(x_win, ((0, m_pad - M), (0, 0)))
    m_tiles = m_pad // tm_eff

    # --- K tiling: only tile when K is large (real backbone hidden dims). ---
    if tk is None:
        if K <= 2048:
            tk = K
        else:
            tk = next((c for c in (512, 256, 128) if K % c == 0), K)
    tk = min(tk, K)
    assert K % tk == 0, "K must be divisible by the K tile"
    assert tk == K or tk % 128 == 0, "K tile must be lane-aligned or full K"
    k_tiles = K // tk

    # --- N tiling: weight fully resident (tn = N) when >= 2 M tiles; for very
    # short inputs split N in two so both v7x TensorCores get a parallel step.
    if m_tiles >= 2 or (N // 2) % 128 != 0:
        tn = N
    else:
        tn = N // 2
    n_tiles = N // tn

    grid = (m_tiles, n_tiles, k_tiles)

    out_isz = jnp.dtype(out_dtype).itemsize
    x_isz = x_win.dtype.itemsize
    w_isz = w_flat.dtype.itemsize

    # VMEM budget: double-buffered blocks (+ accumulator scratch if K-tiled).
    vmem_budget = (2 * tm_eff * tk * x_isz        # activation tiles
                   + 2 * tk * tn * w_isz          # weight tiles
                   + 2 * tn * 4                   # bias tiles
                   + 2 * tm_eff * tn * out_isz)   # output tiles
    if k_tiles > 1:
        vmem_budget += tm_eff * tn * 4            # f32 accumulator scratch
    vmem_limit = int(min(vmem_budget + (8 << 20), 64 << 20))

    # Weight is read once only when it is genuinely resident across the grid.
    w_passes = 1 if (n_tiles == 1 and k_tiles == 1) else m_tiles
    cost = pl.CostEstimate(
        flops=2 * m_pad * K * N,
        transcendentals=0,
        bytes_accessed=int(m_pad * K * x_isz * n_tiles
                           + K * N * w_isz * w_passes
                           + N * 4
                           + m_pad * N * out_isz),
    )

    if k_tiles == 1:
        kernel = _proj_kernel
        scratch = ()
    else:
        kernel = _proj_kernel_ktiled
        scratch = (pltpu.VMEM((tm_eff, tn), jnp.float32),)

    out = pl.pallas_call(
        kernel,
        out_shape=jax.ShapeDtypeStruct((m_pad, N), out_dtype),
        grid_spec=pltpu.PrefetchScalarGridSpec(
            num_scalar_prefetch=0,
            grid=grid,
            in_specs=[
                pl.BlockSpec((tm_eff, tk), lambda i, j, k: (i, k)),  # activations
                pl.BlockSpec((tk, tn), lambda i, j, k: (k, j)),      # weight
                pl.BlockSpec((1, tn), lambda i, j, k: (0, j)),       # bias
            ],
            out_specs=pl.BlockSpec((tm_eff, tn), lambda i, j, k: (i, j)),
            scratch_shapes=scratch,
        ),
        compiler_params=pltpu.CompilerParams(
            dimension_semantics=("parallel", "parallel", "arbitrary"),
            vmem_limit_bytes=vmem_limit,
        ),
        cost_estimate=cost,
    )(x_win, w_flat, bias2d)

    if m_pad != M:
        out = out[:M]
    return out


# ----------------------------------------------------------------------------
# Parameter preparation — done ONCE at load time (hoisted out of forward).
# ----------------------------------------------------------------------------
def prepare_cnn_head_params(conv_w, conv_b):
    """conv_w: (O, H, r) PyTorch Conv1d layout; conv_b: (O,).

    Returns (w_flat_bf16, bias2d_f32) with w_flat[k*H + c, o] == conv_w[o, c, k].
    """
    O, H, r = conv_w.shape
    w_flat = jnp.transpose(conv_w, (2, 1, 0)).reshape(r * H, O)
    w_flat = w_flat.astype(jnp.bfloat16)           # halve weight DMA traffic
    bias2d = conv_b.reshape(1, O).astype(jnp.float32)
    return w_flat, bias2d


# ----------------------------------------------------------------------------
# AudioEncoder "cnn" down-sample head forward
# ----------------------------------------------------------------------------
def audio_encoder_cnn_head(last_hidden_state, w_flat, bias2d, reduce_factor,
                           *, tm=512, tk=None, out_dtype=jnp.bfloat16):
    """
    last_hidden_state: (B, T, H) f32   -- backbone output
    w_flat:            (r*H, O)  bf16  -- prepared by prepare_cnn_head_params
    bias2d:            (1, O)    f32
    returns            (B, T // r, O)  -- matches PyTorch `res`
    """
    B, T, H = last_hidden_state.shape
    r = reduce_factor
    O = w_flat.shape[1]
    T_out = T // r

    # Non-overlapping windows: (B, T_out, r, H) -> (B*T_out, r*H); flat k*H + c.
    # No wrapper-side dtype cast: the bf16 cast is fused into the kernel.
    x_win = last_hidden_state[:, : T_out * r, :].reshape(B * T_out, r * H)

    out = conv1d_proj_pallas(x_win, w_flat, bias2d, tm=tm, tk=tk,
                             out_dtype=out_dtype)            # (B*T_out, O)
    return out.reshape(B, T_out, O)


# ----------------------------------------------------------------------------
if __name__ == "__main__":
    # Small shapes consistent with the module:
    #   acfg.hidden_dim = 32, acfg.down_sample.reduce_factor = 4,
    #   lan_model_dim = 5120 (hard-coded in the module).
    B, T, H = 2, 16, 32
    reduce_factor = 4
    lan_model_dim = 5120

    key = jax.random.PRNGKey(0)
    k_x, k_w, k_b, k_x2, k_w2 = jax.random.split(key, 5)

    # Deterministic stand-in for backbone `last_hidden_state`.
    hidden = jax.random.normal(k_x, (B, T, H), dtype=jnp.float32)

    # Conv1d parameters (PyTorch layout: (out_ch, in_ch, kernel)).
    fan_in = H * reduce_factor
    bound = 1.0 / (fan_in ** 0.5)
    conv_w = jax.random.uniform(
        k_w, (lan_model_dim, H, reduce_factor), jnp.float32, -bound, bound)
    conv_b = jax.random.uniform(
        k_b, (lan_model_dim,), jnp.float32, -bound, bound)

    # One-time parameter prep (hoisted out of the per-call path).
    w_flat_bf16, bias2d = prepare_cnn_head_params(conv_w, conv_b)

    # ---- Test 1: default path (bf16 output, single-K fast path) ------------
    head = jax.jit(audio_encoder_cnn_head, static_argnums=(3,))
    res = jax.block_until_ready(head(hidden, w_flat_bf16, bias2d, reduce_factor))

    T_out = T // reduce_factor
    x_win = hidden.reshape(B * T_out, reduce_factor * H)
    w_flat_f32 = jnp.transpose(conv_w, (2, 1, 0)).reshape(reduce_factor * H,
                                                          lan_model_dim)
    # (a) bf16-input-matched reference (f32 accumulation)
    ref_bf16 = (jnp.dot(x_win.astype(jnp.bfloat16).astype(jnp.float32),
                        w_flat_f32.astype(jnp.bfloat16).astype(jnp.float32))
                + conv_b).reshape(B, T_out, lan_model_dim)
    # (b) full-precision f32 reference
    ref_f32 = (x_win @ w_flat_f32 + conv_b).reshape(B, T_out, lan_model_dim)

    assert res.shape == (B, T_out, lan_model_dim)
    assert res.dtype == jnp.bfloat16
    assert jnp.max(jnp.abs(res.astype(jnp.float32) - ref_bf16)) < 2e-2, \
        "mismatch vs bf16-matched ref"
    assert jnp.max(jnp.abs(res.astype(jnp.float32) - ref_f32)) < 6e-2, \
        "mismatch vs f32 ref"

    # ---- Test 2: K-tiled accumulator path, f32 output -----------------------
    # Exercise the K grid axis (used for realistic backbone hidden dims) by
    # forcing tk=128 with K = r*H = 256.
    H2, r2 = 64, 4
    hidden2 = jax.random.normal(k_x2, (B, T, H2), dtype=jnp.float32)
    fan_in2 = H2 * r2
    bound2 = 1.0 / (fan_in2 ** 0.5)
    conv_w2 = jax.random.uniform(
        k_w2, (lan_model_dim, H2, r2), jnp.float32, -bound2, bound2)
    w_flat2, bias2d2 = prepare_cnn_head_params(conv_w2, conv_b)

    @functools.partial(jax.jit, static_argnums=(3,))
    def head_ktiled(x, w, b, r):
        return audio_encoder_cnn_head(x, w, b, r, tk=128,
                                      out_dtype=jnp.float32)

    res2 = jax.block_until_ready(head_ktiled(hidden2, w_flat2, bias2d2, r2))

    T_out2 = T // r2
    x_win2 = hidden2.reshape(B * T_out2, r2 * H2)
    w2_f32 = jnp.transpose(conv_w2, (2, 1, 0)).reshape(r2 * H2, lan_model_dim)
    ref2 = (x_win2 @ w2_f32 + conv_b).reshape(B, T_out2, lan_model_dim)

    assert res2.shape == (B, T_out2, lan_model_dim)
    assert res2.dtype == jnp.float32
    assert jnp.max(jnp.abs(res2 - ref2)) < 6e-2, "K-tiled path mismatch vs f32 ref"

    print("KERNEL_OK")
</pallas_src>

<mosaic_0001>
module attributes {stable_mosaic.version = 11 : i64} {
  func.func @_proj_kernel(%arg0: i32, %arg1: i32, %arg2: i32, %arg3: memref<8x128xf32, #tpu.memory_space<vmem>>, %arg4: memref<128x2560xbf16, #tpu.memory_space<vmem>>, %arg5: memref<1x2560xf32, #tpu.memory_space<vmem>>, %arg6: memref<8x2560xbf16, #tpu.memory_space<vmem>>) attributes {dimension_semantics = [#tpu.dimension_semantics<parallel>, #tpu.dimension_semantics<parallel>, #tpu.dimension_semantics<arbitrary>], iteration_bounds = array<i64: 1, 2, 1>, scalar_prefetch = 0 : i64, scratch_operands = 0 : i64, tpu.core_type = #tpu.core_type<tc>, window_params = [{transform_indices = @transform_0, window_bounds = array<i64: 8, 128>}, {transform_indices = @transform_1, window_bounds = array<i64: 128, 2560>}, {transform_indices = @transform_2, window_bounds = array<i64: 1, 2560>}, {transform_indices = @transform_3, window_bounds = array<i64: 8, 2560>}]} {
    %c0 = arith.constant 0 : index
    %c0_0 = arith.constant 0 : index
    %0 = vector.load %arg3[%c0, %c0_0] : memref<8x128xf32, #tpu.memory_space<vmem>>, vector<8x128xf32>
    %1 = arith.truncf %0 : vector<8x128xf32> to vector<8x128xbf16>
    %c0_1 = arith.constant 0 : index
    %c0_2 = arith.constant 0 : index
    %2 = vector.load %arg4[%c0_1, %c0_2] : memref<128x2560xbf16, #tpu.memory_space<vmem>>, vector<128x2560xbf16>
    %cst = arith.constant dense<0.000000e+00> : vector<8x2560xf32>
    %3 = tpu.matmul %1, %2, %cst {dimension_numbers = #tpu.dot_dimension_numbers<[1], [0], [0], [1], [0, 0, 1, 1], [], []>} : vector<8x128xbf16>, vector<128x2560xbf16>, vector<8x2560xf32> -> vector<8x2560xf32>
    %c0_3 = arith.constant 0 : index
    %c0_4 = arith.constant 0 : index
    %4 = vector.load %arg5[%c0_3, %c0_4] : memref<1x2560xf32, #tpu.memory_space<vmem>>, vector<1x2560xf32>
    %5 = vector.broadcast %4 : vector<1x2560xf32> to vector<8x2560xf32>
    %6 = arith.addf %3, %5 : vector<8x2560xf32>
    %7 = arith.truncf %6 : vector<8x2560xf32> to vector<8x2560xbf16>
    %c0_5 = arith.constant 0 : index
    %c0_6 = arith.constant 0 : index
    %8 = vector.load %arg6[%c0_5, %c0_6] : memref<8x2560xbf16, #tpu.memory_space<vmem>>, vector<8x2560xbf16>
    tpu.vector_store %arg6[%c0_5, %c0_6], %7 {strides = array<i32>} : memref<8x2560xbf16, #tpu.memory_space<vmem>>, vector<8x2560xbf16>,
    return
  }
  func.func @transform_0(%arg0: i32, %arg1: i32, %arg2: i32) -> (i32, i32) {
    %c0_i32 = arith.constant 0 : i32
    return %arg0, %arg2 : i32, i32
  }
  func.func @transform_1(%arg0: i32, %arg1: i32, %arg2: i32) -> (i32, i32) {
    %c0_i32 = arith.constant 0 : i32
    return %arg2, %arg1 : i32, i32
  }
  func.func @transform_2(%arg0: i32, %arg1: i32, %arg2: i32) -> (i32, i32) {
    %c0_i32 = arith.constant 0 : i32
    %c0_i32_0 = arith.constant 0 : i32
    return %c0_i32, %arg1 : i32, i32
  }
  func.func @transform_3(%arg0: i32, %arg1: i32, %arg2: i32) -> (i32, i32) {
    %c0_i32 = arith.constant 0 : i32
    return %arg0, %arg1 : i32, i32
  }
}

</mosaic_0001>

<bundles_post_ra>
// kernel: audio_encoder_cnn_head.1
= control target key start
LH: loop header
LB: loop body
LE: loop exit
PB: predicated region body
PF: predicated region fallthrough
CT: control target
= control target key end

     0   :  { %8 = vsyncpa [#allocation3], 0  ;;  %s2995_s0 = inlined_call_operand.vmem [shape: f32[8,128], index: 0, kind: input, shape index: {}]   ;;  %s2996_s1 = inlined_call_operand.hbm [shape: bf16[128,5120], index: 1, kind: input, shape index: {}]   ;;  %s2997_s2 = inlined_call_operand.hbm [shape: f32[1,5120], index: 2, kind: input, shape index: {}]   ;;  %s2998_s3 = inlined_call_operand.vmem [shape: bf16[8,5120], index: 3, kind: output, shape index: {}]  }
   0x1   :  { %10 = vsyncpa [#allocation3 + $0x1], 0 }
   0x2   :  { %11 = vsyncpa [#allocation5], 0 }
   0x3   :  { %13 = vsyncpa [#allocation5 + $0x1], 0  ;;  %s2642_s12 = smov 0   ;;  %s2644_s13 = smov 0  }
   0x4   :  { %s2646_s14 = smov 0   ;;  %s2648_s15 = smov 0  }
   0x5   :  { %s2650_s16 = smov 0   ;;  %s2652_s17 = smov 0  }
   0x6 LB: > { %s2003_s18 = sadd.s32 4294967295, %s2614_s17   ;;  %s34_s19 = sadd.s32 1, %s2610_s16  ;;  %s2614_s17 = sphi %s2652_s17, %s19_s17   ;;  %s2610_s16 = sphi %s2650_s16, %s3006_s16   ;;  %s2606_s15 = sphi %s2648_s15, %s3005_s15   ;;  %s2602_s14 = sphi %s2646_s14, %s3004_s14   ;;  %s2598_s13 = sphi %s2644_s13, %s3003_s13   ;;  %s2594_s12 = sphi %s2642_s12, %s3002_s12  }
   0x7   : > { %p36_p0 = scmp.ge.s32.totalorder %s34_s19, 2  ;;  %s75_s20 = sadd.s32 1, %s2602_s14 }
   0x8   : > { %p82_p1 = scmp.ne.s32.totalorder %s2602_s14, %s2598_s13  ;;  %p83_p2 = scmp.eq.s32.totalorder %s2614_s17, 0 }
   0x9   : > { %s3008_s19 = smov (%p36_p0, %s34_s19), 0  ;;  %p88_p4 = scmp.ne.s32.totalorder %s2598_s13, %s2594_s12 }
   0xa   : > { %p84_p3 = por %p83_p2, %p82_p1  ;;  %s71_s21 = ssub.s32 %s2610_s16, %s3008_s19 }
   0xb   : > { %p89_p5 = scmp.eq.s32.totalorder %s2003_s18, 0  ;;  %p73_p6 = scmp.eq.s32.totalorder %s71_s21, 0 }
   0xc   : > { %p2211_p8 = scmp.lt.s32.totalorder %s2614_s17, 2  ;;  %s2690_s24 = sand.u32 1, %s2602_s14  }
   0xd   : > { %p2681_p7 = por %p89_p5, %p88_p4  ;;  %s2184_s25 = smul.u32 1280, %s2610_s16 }
   0xe   : > { %s2687_s23 = scalar_select %p73_p6, %s2602_s14, %s75_s20  }
   0xf   : > { %s2196_s26 = smul.u32 1280, %s2690_s24  ;;  %s189_s29 = scalar_lea.hbm %s2996_s1, %s2184_s25 }
  0x10   : > { %p2697_p9 = pnand %p2211_p8, %p84_p3  ;;  %p2010_p10 = scmp.ge.s32.totalorder %s2614_s17, 1 }
  0x11   : > { %s180_s4 = scalar_lea.vmem [#allocation2], %s2196_s26  ;;  %s177_s6 = scalar_lea.sflag [#allocation3], %s2690_s24 }
  0x12   : > { %s190_s5 = sshll.u32 %s180_s4, 4  ;;  %p2506_p11 = pneg %p2697_p9  ;;  %s191_s5 = int_to_ptr.vmem [resolvable:$true] %s190_s5 }
  0x13   : > { %s2517_s7 = scalar_lea.vmem %s191_s5, 20480  ;;  %s2616_s8 = smov [#allocation2]  }
  0x14   : > { %p2518_p12 = scmp.ne.s32.totalorder %s191_s5, %s2517_s7  ;;  %s2522_s9 = sshll.u32 %s2616_s8, 4  ;;  %s2523_s9 = int_to_ptr.vmem [resolvable:$false] %s2522_s9 }
  0x15   : > { %s2524_s10 = scalar_lea.vmem %s2523_s9, 40960  ;;  %p2525_p1 = scmp.lt.s32.totalorder %s191_s5, %s2523_s9 }
  0x16   : > { %p2520_p13 = pnand %p2518_p12, %p2506_p11  ;;  %p2526_p2 = scmp.lt.s32.totalorder %s2524_s10, %s2517_s7 }
  0x18   : > { %p2521_p0 = pneg %p2520_p13  ;;  %p2527_p3 = por %p2526_p2, %p2525_p1 }
  0x1a   : > { %p2528_p4 = pnand %p2527_p3, %p2521_p0 }
  0x1c   : > { %2531 = shalt.err (!%p2528_p4)
}
  0x1d   : > { %s2617_s11 = smov 2560   ;;  %s2618_s12 = smov 1280  }
  0x1e   : > { %s2619_s18 = smov 80   ;;  %p217_p5 = scmp.lt.s32.totalorder %s2614_s17, 3 }
  0x1f   : > { %2207 = dma.hbm_to_vmem [thread:$0]  (!%p2697_p9), %s189_s29, 20480, %s191_s5, %s177_s6, %s2617_s11, %s2618_s12, %s2619_s18  }
  0x20   : > { %s2197_s20 = smul.u32 20, %s2690_s24  ;;  %p2714_p6 = pnand %p2010_p10, %p217_p5 }
  0x21   : > { %s2185_s25 = smul.u32 320, %s2610_s16  ;;  %s201_s8 = scalar_lea.sflag [#allocation5], %s2690_s24 }
  0x22   : > { %s204_s4 = scalar_lea.vmem [#allocation4], %s2197_s20  ;;  %s2620_s29 = smov [#allocation4]  }
  0x23   : > { %s210_s28 = scalar_lea.hbm %s2997_s2, %s2185_s25  ;;  %s212_s7 = sshll.u32 %s204_s4, 4  ;;  %s213_s7 = int_to_ptr.vmem [resolvable:$true] %s212_s7 }
  0x24   : > { %s2545_s9 = scalar_lea.vmem %s213_s7, 320  ;;  %s2550_s5 = sshll.u32 %s2620_s29, 4  ;;  %s2551_s5 = int_to_ptr.vmem [resolvable:$false] %s2550_s5 }
  0x25   : > { %p2546_p8 = scmp.ne.s32.totalorder %s213_s7, %s2545_s9  ;;  %s2552_s6 = scalar_lea.vmem %s2551_s5, 640 }
  0x26   : > { %p2553_p10 = scmp.lt.s32.totalorder %s213_s7, %s2551_s5  ;;  %p2554_p0 = scmp.lt.s32.totalorder %s2552_s6, %s2545_s9 }
  0x27   : > { %p2548_p12 = pnand %p2546_p8, %p2506_p11 }
  0x28   : > { %p2555_p1 = por %p2554_p0, %p2553_p10 }
  0x29   : > { %p2549_p13 = pneg %p2548_p12 }
  0x2b   : > { %p2556_p2 = pnand %p2555_p1, %p2549_p13 }
  0x2d   : > { %2559 = shalt.err (!%p2556_p2)
}
  0x2e   : > { %2210 = dma.hbm_to_vmem [thread:$0]  (!%p2697_p9), %s210_s28, 320, %s213_s7, %s201_s8  }
  0x2f   : > { %221 = sbr.rel (%p2714_p6) target bundleno = 419 (0x1a3), region = 32  ;;  %s223_s24 = sand.u32 (!%p2714_p6), 1, %s2598_s13  }
  0x30   : > { %s2198_s10 = smul.u32 (!%p2714_p6), 1280, %s223_s24  ;;  %s224_s11 = scalar_lea.sflag (!%p2714_p6), [#allocation3], %s223_s24 }
  0x32   : > { %s2731_s12 = scalar_lea.vmem (!%p2714_p6), [#allocation2], %s2198_s10 }
  0x34   : > { %2585 = dma.done.wait (%p2681_p7), %s224_s11, 20480  }
  0x35   : > { %2587 = vsyncadd (%p2681_p7), %s224_s11, 4294946816  ;;  %s2199_s18 = smul.u32 20, %s223_s24  ;;  %s233_s20 = scalar_lea.sflag [#allocation5], %s223_s24 }
  0x37   : > { %s2737_s30 = scalar_lea.vmem [#allocation4], %s2199_s18 }
  0x38   : > { %2589 = dma.done.wait (%p2681_p7), %s233_s20, 320  }
  0x39   : > { %2591 = vsyncadd (%p2681_p7), %s233_s20, 4294966976  ;;  %v2621_v0 = vmov 0   ;;  %v2264_v1 = vld [vmem:[%s2731_s12 + $0x464] ss:$80 sps:$4 sm:$0xff]   ;;  %v2266_v2 = vld [vmem:[%s2731_s12 + $0x46c] ss:$80 sps:$4 sm:$0xff]  }
  0x3a   : > { %1396 = vmatprep.mubr.bf16.mxu0 %v2621_v0  ;;  %1437 = vmatprep.mubr.bf16.mxu1 %v2621_v0  ;;  %v2268_v3 = vld [vmem:[%s2731_s12 + $0x460] ss:$80 sps:$4 sm:$0xff]   ;;  %v2269_v4 = vld [vmem:[%s2731_s12 + $0x468] ss:$80 sps:$4 sm:$0xff]   ;;  %v2270_v5 = vld [vmem:[%s2731_s12 + $0x3c4] ss:$80 sps:$4 sm:$0xff]  }
  0x3b   : > { %1364 = vmatprep.subr.bf16.mxu0 %v2264_v1  ;;  %1405 = vmatprep.subr.bf16.mxu1 %v2266_v2  ;;  %v2272_v6 = vld [vmem:[%s2731_s12 + $0x3cc] ss:$80 sps:$4 sm:$0xff]   ;;  %v2274_v7 = vld [vmem:[%s2731_s12 + $0x3c0] ss:$80 sps:$4 sm:$0xff]   ;;  %v2275_v8 = vld [vmem:[%s2731_s12 + $0x3c8] ss:$80 sps:$4 sm:$0xff]  }
  0x3c   : > { %1365 = vmatpush1.bf16.msra.mxu0 %v2268_v3  ;;  %1406 = vmatpush1.bf16.msra.mxu1 %v2269_v4  ;;  %v2276_v9 = vld [vmem:[%s2731_s12 + $0x324] ss:$80 sps:$4 sm:$0xff]   ;;  %v2278_v10 = vld [vmem:[%s2731_s12 + $0x32c] ss:$80 sps:$4 sm:$0xff]   ;;  %v2280_v11 = vld [vmem:[%s2731_s12 + $0x320] ss:$80 sps:$4 sm:$0xff]  }
  0x3d   : > { %1366 = vmatprep.subr.bf16.mxu0 %v2270_v5  ;;  %1407 = vmatprep.subr.bf16.mxu1 %v2272_v6  ;;  %v2281_v12 = vld [vmem:[%s2731_s12 + $0x328] ss:$80 sps:$4 sm:$0xff]   ;;  %v2282_v13 = vld [vmem:[%s2731_s12 + $0x284] ss:$80 sps:$4 sm:$0xff]   ;;  %v2284_v14 = vld [vmem:[%s2731_s12 + $0x28c] ss:$80 sps:$4 sm:$0xff]  }
  0x3e   : > { %v2286_v15 = vld [vmem:[%s2731_s12 + $0x280] ss:$80 sps:$4 sm:$0xff]   ;;  %v2287_v16 = vld [vmem:[%s2731_s12 + $0x288] ss:$80 sps:$4 sm:$0xff]   ;;  %v2288_v17 = vld [vmem:[%s2731_s12 + $0x1e4] ss:$80 sps:$4 sm:$0xff]  }
  0x3f   : > { %v2290_v18 = vld [vmem:[%s2731_s12 + $0x1ec] ss:$80 sps:$4 sm:$0xff]   ;;  %v2292_v19 = vld [vmem:[%s2731_s12 + $0x1e0] ss:$80 sps:$4 sm:$0xff]   ;;  %v2293_v20 = vld [vmem:[%s2731_s12 + $0x1e8] ss:$80 sps:$4 sm:$0xff]  }
  0x40   : > { %1367 = vmatpush1.bf16.msra.mxu0 %v2274_v7  ;;  %1408 = vmatpush1.bf16.msra.mxu1 %v2275_v8  ;;  %v2294_v21 = vld [vmem:[%s2731_s12 + $0x144] ss:$80 sps:$4 sm:$0xff]   ;;  %v2296_v22 = vld [vmem:[%s2731_s12 + $0x14c] ss:$80 sps:$4 sm:$0xff]   ;;  %v2298_v23 = vld [vmem:[%s2731_s12 + $0x140] ss:$80 sps:$4 sm:$0xff]  }
  0x41   : > { %1368 = vmatprep.subr.bf16.mxu0 %v2276_v9  ;;  %1409 = vmatprep.subr.bf16.mxu1 %v2278_v10  ;;  %v2299_v24 = vld [vmem:[%s2731_s12 + $0x148] ss:$80 sps:$4 sm:$0xff]   ;;  %v2300_v25 = vld [vmem:[%s2731_s12 + $0xa4] ss:$80 sps:$4 sm:$0xff]   ;;  %v2302_v26 = vld [vmem:[%s2731_s12 + $0xac] ss:$80 sps:$4 sm:$0xff]  }
  0x42   : > { %v2304_v27 = vld [vmem:[%s2731_s12 + $0xa0] ss:$80 sps:$4 sm:$0xff]   ;;  %v2305_v28 = vld [vmem:[%s2731_s12 + $0xa8] ss:$80 sps:$4 sm:$0xff]   ;;  %v2306_v29 = vld [vmem:[%s2731_s12 + $0x4] ss:$80 sps:$4 sm:$0xff]  }
  0x43   : > { %v2308_v30 = vld [vmem:[%s2731_s12 + $0xc] ss:$80 sps:$4 sm:$0xff]   ;;  %v2310_v31 = vld [vmem:[%s2731_s12] ss:$80 sps:$4 sm:$0xff]   ;;  %v2311_v32 = vld [vmem:[%s2731_s12 + $0x8] ss:$80 sps:$4 sm:$0xff]  }
  0x44   : > { %1369 = vmatpush1.bf16.msra.mxu0 %v2280_v11  ;;  %1410 = vmatpush1.bf16.msra.mxu1 %v2281_v12  ;;  %v296_v33 = vld [vmem:[%s2995_s0] sm:$0xff]  ;;  %v2317_v35 = vld [vmem:[%s2731_s12 + $0x47c] ss:$80 sps:$4 sm:$0xff]   ;;  %v2315_v38 = vld [vmem:[%s2731_s12 + $0x478] ss:$80 sps:$4 sm:$0xff]   ;;  %s285_s25 = smul.u32 20, %s2606_s15 }
  0x45   : > { %1370 = vmatprep.subr.bf16.mxu0 %v2282_v13  ;;  %1411 = vmatprep.subr.bf16.mxu1 %v2284_v14  ;;  %v2314_v34 = vld [vmem:[%s2731_s12 + $0x474] ss:$80 sps:$4 sm:$0xff]   ;;  %v2782_v36 = vpack.c.bf16 %v296_v33, %v296_v33  ;;  %v2312_v37 = vld [vmem:[%s2731_s12 + $0x470] ss:$80 sps:$4 sm:$0xff]   ;;  %v2323_v40 = vld [vmem:[%s2731_s12 + $0x3dc] ss:$80 sps:$4 sm:$0xff]  }
  0x46   : > { %v2320_v39 = vld [vmem:[%s2731_s12 + $0x3d4] ss:$80 sps:$4 sm:$0xff]   ;;  %v2318_v41 = vld [vmem:[%s2731_s12 + $0x3d0] ss:$80 sps:$4 sm:$0xff]   ;;  %v2321_v42 = vld [vmem:[%s2731_s12 + $0x3d8] ss:$80 sps:$4 sm:$0xff]  }
  0x47   : > { %v2326_v43 = vld [vmem:[%s2731_s12 + $0x334] ss:$80 sps:$4 sm:$0xff]   ;;  %v2329_v44 = vld [vmem:[%s2731_s12 + $0x33c] ss:$80 sps:$4 sm:$0xff]   ;;  %v2324_v45 = vld [vmem:[%s2731_s12 + $0x330] ss:$80 sps:$4 sm:$0xff]  }
  0x48   : > { %1371 = vmatpush1.bf16.msra.mxu0 %v2286_v15  ;;  %1412 = vmatpush1.bf16.msra.mxu1 %v2287_v16  ;;  %v2327_v46 = vld [vmem:[%s2731_s12 + $0x338] ss:$80 sps:$4 sm:$0xff]   ;;  %v2332_v47 = vld [vmem:[%s2731_s12 + $0x294] ss:$80 sps:$4 sm:$0xff]   ;;  %v2335_v48 = vld [vmem:[%s2731_s12 + $0x29c] ss:$80 sps:$4 sm:$0xff]  }
  0x49   : > { %1372 = vmatprep.subr.bf16.mxu0 %v2288_v17  ;;  %1413 = vmatprep.subr.bf16.mxu1 %v2290_v18  ;;  %v2330_v49 = vld [vmem:[%s2731_s12 + $0x290] ss:$80 sps:$4 sm:$0xff]   ;;  %v2333_v50 = vld [vmem:[%s2731_s12 + $0x298] ss:$80 sps:$4 sm:$0xff]   ;;  %v2338_v51 = vld [vmem:[%s2731_s12 + $0x1f4] ss:$80 sps:$4 sm:$0xff]  }
  0x4a   : > { %v2341_v52 = vld [vmem:[%s2731_s12 + $0x1fc] ss:$80 sps:$4 sm:$0xff]   ;;  %v2336_v53 = vld [vmem:[%s2731_s12 + $0x1f0] ss:$80 sps:$4 sm:$0xff]   ;;  %v2339_v54 = vld [vmem:[%s2731_s12 + $0x1f8] ss:$80 sps:$4 sm:$0xff]  }
  0x4b   : > { %v2344_v55 = vld [vmem:[%s2731_s12 + $0x154] ss:$80 sps:$4 sm:$0xff]   ;;  %v2347_v56 = vld [vmem:[%s2731_s12 + $0x15c] ss:$80 sps:$4 sm:$0xff]   ;;  %v2342_v57 = vld [vmem:[%s2731_s12 + $0x150] ss:$80 sps:$4 sm:$0xff]  }
  0x4c   : > { %1373 = vmatpush1.bf16.msra.mxu0 %v2292_v19  ;;  %1414 = vmatpush1.bf16.msra.mxu1 %v2293_v20  ;;  %v2345_v58 = vld [vmem:[%s2731_s12 + $0x158] ss:$80 sps:$4 sm:$0xff]   ;;  %v2350_v59 = vld [vmem:[%s2731_s12 + $0xb4] ss:$80 sps:$4 sm:$0xff]   ;;  %v2353_v60 = vld [vmem:[%s2731_s12 + $0xbc] ss:$80 sps:$4 sm:$0xff]  }
  0x4d   : > { %1374 = vmatprep.subr.bf16.mxu0 %v2294_v21  ;;  %1415 = vmatprep.subr.bf16.mxu1 %v2296_v22  ;;  %v2348_v61 = vld [vmem:[%s2731_s12 + $0xb0] ss:$80 sps:$4 sm:$0xff]   ;;  %v2351_v62 = vld [vmem:[%s2731_s12 + $0xb8] ss:$80 sps:$4 sm:$0xff]   ;;  %v2356_v63 = vld [vmem:[%s2731_s12 + $0x14] ss:$80 sps:$4 sm:$0xff]  }
  0x4e   : > { %v2359_v1 = vld [vmem:[%s2731_s12 + $0x1c] ss:$80 sps:$4 sm:$0xff]   ;;  %v2354_v2 = vld [vmem:[%s2731_s12 + $0x10] ss:$80 sps:$4 sm:$0xff]   ;;  %v2357_v3 = vld [vmem:[%s2731_s12 + $0x18] ss:$80 sps:$4 sm:$0xff]  }
  0x4f   : > { %v2362_v4 = vld [vmem:[%s2731_s12 + $0x484] ss:$80 sps:$4 sm:$0xff]   ;;  %v2365_v5 = vld [vmem:[%s2731_s12 + $0x48c] ss:$80 sps:$4 sm:$0xff]   ;;  %v2360_v6 = vld [vmem:[%s2731_s12 + $0x480] ss:$80 sps:$4 sm:$0xff]  }
  0x50   : > { %1375 = vmatpush1.bf16.msra.mxu0 %v2298_v23  ;;  %1416 = vmatpush1.bf16.msra.mxu1 %v2299_v24  ;;  %v2363_v7 = vld [vmem:[%s2731_s12 + $0x488] ss:$80 sps:$4 sm:$0xff]   ;;  %v2368_v8 = vld [vmem:[%s2731_s12 + $0x3e4] ss:$80 sps:$4 sm:$0xff]   ;;  %v2371_v9 = vld [vmem:[%s2731_s12 + $0x3ec] ss:$80 sps:$4 sm:$0xff]  }
  0x51   : > { %1376 = vmatprep.subr.bf16.mxu0 %v2300_v25  ;;  %1417 = vmatprep.subr.bf16.mxu1 %v2302_v26  ;;  %v2366_v10 = vld [vmem:[%s2731_s12 + $0x3e0] ss:$80 sps:$4 sm:$0xff]   ;;  %v2369_v11 = vld [vmem:[%s2731_s12 + $0x3e8] ss:$80 sps:$4 sm:$0xff]   ;;  %v2374_v12 = vld [vmem:[%s2731_s12 + $0x344] ss:$80 sps:$4 sm:$0xff]  }
  0x52   : > { %v2377_v13 = vld [vmem:[%s2731_s12 + $0x34c] ss:$80 sps:$4 sm:$0xff]   ;;  %v2372_v14 = vld [vmem:[%s2731_s12 + $0x340] ss:$80 sps:$4 sm:$0xff]   ;;  %v2375_v15 = vld [vmem:[%s2731_s12 + $0x348] ss:$80 sps:$4 sm:$0xff]  }
  0x53   : > { %v2380_v16 = vld [vmem:[%s2731_s12 + $0x2a4] ss:$80 sps:$4 sm:$0xff]   ;;  %v2383_v17 = vld [vmem:[%s2731_s12 + $0x2ac] ss:$80 sps:$4 sm:$0xff]   ;;  %v2378_v18 = vld [vmem:[%s2731_s12 + $0x2a0] ss:$80 sps:$4 sm:$0xff]  }
  0x54   : > { %1377 = vmatpush1.bf16.msra.mxu0 %v2304_v27  ;;  %1418 = vmatpush1.bf16.msra.mxu1 %v2305_v28  ;;  %v2381_v19 = vld [vmem:[%s2731_s12 + $0x2a8] ss:$80 sps:$4 sm:$0xff]   ;;  %v2386_v20 = vld [vmem:[%s2731_s12 + $0x204] ss:$80 sps:$4 sm:$0xff]   ;;  %v2389_v21 = vld [vmem:[%s2731_s12 + $0x20c] ss:$80 sps:$4 sm:$0xff]  }
  0x55   : > { %1378 = vmatprep.subr.bf16.mxu0 %v2306_v29  ;;  %1419 = vmatprep.subr.bf16.mxu1 %v2308_v30  ;;  %v2384_v22 = vld [vmem:[%s2731_s12 + $0x200] ss:$80 sps:$4 sm:$0xff]   ;;  %v2387_v23 = vld [vmem:[%s2731_s12 + $0x208] ss:$80 sps:$4 sm:$0xff]   ;;  %v2392_v24 = vld [vmem:[%s2731_s12 + $0x164] ss:$80 sps:$4 sm:$0xff]  }
  0x56   : > { %v2395_v25 = vld [vmem:[%s2731_s12 + $0x16c] ss:$80 sps:$4 sm:$0xff]   ;;  %v2390_v26 = vld [vmem:[%s2731_s12 + $0x160] ss:$80 sps:$4 sm:$0xff]   ;;  %v2393_v27 = vld [vmem:[%s2731_s12 + $0x168] ss:$80 sps:$4 sm:$0xff]  }
  0x57   : > { %v2398_v28 = vld [vmem:[%s2731_s12 + $0xc4] ss:$80 sps:$4 sm:$0xff]   ;;  %v2401_v29 = vld [vmem:[%s2731_s12 + $0xcc] ss:$80 sps:$4 sm:$0xff]   ;;  %v2396_v30 = vld [vmem:[%s2731_s12 + $0xc0] ss:$80 sps:$4 sm:$0xff]  }
  0x58   : > { %1379 = vmatpush1.bf16.msra.mxu0 %v2310_v31  ;;  %1420 = vmatpush1.bf16.msra.mxu1 %v2311_v32  ;;  %v2399_v31 = vld [vmem:[%s2731_s12 + $0xc8] ss:$80 sps:$4 sm:$0xff]   ;;  %v2404_v32 = vld [vmem:[%s2731_s12 + $0x24] ss:$80 sps:$4 sm:$0xff]   ;;  %v2407_v33 = vld [vmem:[%s2731_s12 + $0x2c] ss:$80 sps:$4 sm:$0xff]  }
  0x59   : > { %1446 = vmatprep.subr.bf16.mxu0 %v2314_v34  ;;  %1487 = vmatprep.subr.bf16.mxu1 %v2317_v35  ;;  %v2402_v34 = vld [vmem:[%s2731_s12 + $0x20] ss:$80 sps:$4 sm:$0xff]   ;;  %v2405_v35 = vld [vmem:[%s2731_s12 + $0x28] ss:$80 sps:$4 sm:$0xff]   ;;  %p288_p7 = scmp.lt.s32.totalorder %s285_s25, 39 }
  0x5b   : > { %1397 = vmatmul.mubr.bf16.vlgmr.msra.gmra.mxu0 %v2782_v36  ;;  %1438 = vmatmul.mubr.bf16.vlgmr.msra.gmra.mxu1 %v2782_v36  ;;  %s3010_s25 = smov (!%p288_p7, %s285_s25), 39 }
  0x5c   : > { %1447 = vmatpush1.bf16.msra.mxu0 %v2312_v37  ;;  %1488 = vmatpush1.bf16.msra.mxu1 %v2315_v38  ;;  %v2410_v37 = vld [vmem:[%s2731_s12 + $0x494] ss:$80 sps:$4 sm:$0xff]   ;;  %v2413_v38 = vld [vmem:[%s2731_s12 + $0x49c] ss:$80 sps:$4 sm:$0xff]   ;;  %s2011_s15 = sshll.u32 %s3010_s25, 2 }
  0x5d   : > { %1448 = vmatprep.subr.bf16.mxu0 %v2320_v39  ;;  %1489 = vmatprep.subr.bf16.mxu1 %v2323_v40  ;;  %v2408_v39 = vld [vmem:[%s2731_s12 + $0x490] ss:$80 sps:$4 sm:$0xff]   ;;  %v2411_v40 = vld [vmem:[%s2731_s12 + $0x498] ss:$80 sps:$4 sm:$0xff]   ;;  %s2951_s28 = scalar_lea.vmem %s2998_s3, %s2011_s15 }
  0x5e   : > { %1478 = vmatprep.mubr.bf16.mxu0 %v2621_v0  ;;  %1519 = vmatprep.mubr.bf16.mxu1 %v2621_v0 }
  0x60   : > { %1449 = vmatpush1.bf16.msra.mxu0 %v2318_v41  ;;  %1490 = vmatpush1.bf16.msra.mxu1 %v2321_v42  ;;  %v2416_v41 = vld [vmem:[%s2731_s12 + $0x3f4] ss:$80 sps:$4 sm:$0xff]   ;;  %v2419_v42 = vld [vmem:[%s2731_s12 + $0x3fc] ss:$80 sps:$4 sm:$0xff]  }
  0x61   : > { %1450 = vmatprep.subr.bf16.mxu0 %v2326_v43  ;;  %1491 = vmatprep.subr.bf16.mxu1 %v2329_v44  ;;  %v2414_v43 = vld [vmem:[%s2731_s12 + $0x3f0] ss:$80 sps:$4 sm:$0xff]   ;;  %v2417_v44 = vld [vmem:[%s2731_s12 + $0x3f8] ss:$80 sps:$4 sm:$0xff]  }
  0x64   : > { %1451 = vmatpush1.bf16.msra.mxu0 %v2324_v45  ;;  %1492 = vmatpush1.bf16.msra.mxu1 %v2327_v46  ;;  %v2422_v45 = vld [vmem:[%s2731_s12 + $0x354] ss:$80 sps:$4 sm:$0xff]   ;;  %v2425_v46 = vld [vmem:[%s2731_s12 + $0x35c] ss:$80 sps:$4 sm:$0xff]  }
  0x65   : > { %1452 = vmatprep.subr.bf16.mxu0 %v2332_v47  ;;  %1493 = vmatprep.subr.bf16.mxu1 %v2335_v48  ;;  %v2420_v47 = vld [vmem:[%s2731_s12 + $0x350] ss:$80 sps:$4 sm:$0xff]   ;;  %v2423_v48 = vld [vmem:[%s2731_s12 + $0x358] ss:$80 sps:$4 sm:$0xff]  }
  0x68   : > { %1453 = vmatpush1.bf16.msra.mxu0 %v2330_v49  ;;  %1494 = vmatpush1.bf16.msra.mxu1 %v2333_v50  ;;  %v2428_v49 = vld [vmem:[%s2731_s12 + $0x2b4] ss:$80 sps:$4 sm:$0xff]   ;;  %v2431_v50 = vld [vmem:[%s2731_s12 + $0x2bc] ss:$80 sps:$4 sm:$0xff]  }
  0x69   : > { %1454 = vmatprep.subr.bf16.mxu0 %v2338_v51  ;;  %1495 = vmatprep.subr.bf16.mxu1 %v2341_v52  ;;  %v2426_v51 = vld [vmem:[%s2731_s12 + $0x2b0] ss:$80 sps:$4 sm:$0xff]   ;;  %v2429_v52 = vld [vmem:[%s2731_s12 + $0x2b8] ss:$80 sps:$4 sm:$0xff]  }
  0x6c   : > { %1455 = vmatpush1.bf16.msra.mxu0 %v2336_v53  ;;  %1496 = vmatpush1.bf16.msra.mxu1 %v2339_v54  ;;  %v2434_v53 = vld [vmem:[%s2731_s12 + $0x214] ss:$80 sps:$4 sm:$0xff]   ;;  %v2437_v54 = vld [vmem:[%s2731_s12 + $0x21c] ss:$80 sps:$4 sm:$0xff]  }
  0x6d   : > { %1456 = vmatprep.subr.bf16.mxu0 %v2344_v55  ;;  %1497 = vmatprep.subr.bf16.mxu1 %v2347_v56  ;;  %v2432_v55 = vld [vmem:[%s2731_s12 + $0x210] ss:$80 sps:$4 sm:$0xff]   ;;  %v2435_v56 = vld [vmem:[%s2731_s12 + $0x218] ss:$80 sps:$4 sm:$0xff]  }
  0x70   : > { %1457 = vmatpush1.bf16.msra.mxu0 %v2342_v57  ;;  %1498 = vmatpush1.bf16.msra.mxu1 %v2345_v58  ;;  %v2440_v57 = vld [vmem:[%s2731_s12 + $0x174] ss:$80 sps:$4 sm:$0xff]   ;;  %v2443_v58 = vld [vmem:[%s2731_s12 + $0x17c] ss:$80 sps:$4 sm:$0xff]  }
  0x71   : > { %1458 = vmatprep.subr.bf16.mxu0 %v2350_v59  ;;  %1499 = vmatprep.subr.bf16.mxu1 %v2353_v60  ;;  %v2438_v59 = vld [vmem:[%s2731_s12 + $0x170] ss:$80 sps:$4 sm:$0xff]   ;;  %v2441_v60 = vld [vmem:[%s2731_s12 + $0x178] ss:$80 sps:$4 sm:$0xff]  }
  0x74   : > { %1459 = vmatpush1.bf16.msra.mxu0 %v2348_v61  ;;  %1500 = vmatpush1.bf16.msra.mxu1 %v2351_v62  ;;  %v2446_v61 = vld [vmem:[%s2731_s12 + $0xd4] ss:$80 sps:$4 sm:$0xff]   ;;  %v2449_v62 = vld [vmem:[%s2731_s12 + $0xdc] ss:$80 sps:$4 sm:$0xff]  }
  0x75   : > { %1460 = vmatprep.subr.bf16.mxu0 %v2356_v63  ;;  %1501 = vmatprep.subr.bf16.mxu1 %v2359_v1  ;;  %v2444_v63 = vld [vmem:[%s2731_s12 + $0xd0] ss:$80 sps:$4 sm:$0xff]   ;;  %v2447_v1 = vld [vmem:[%s2731_s12 + $0xd8] ss:$80 sps:$4 sm:$0xff]  }
  0x78   : > { %1461 = vmatpush1.bf16.msra.mxu0 %v2354_v2  ;;  %1502 = vmatpush1.bf16.msra.mxu1 %v2357_v3  ;;  %v2452_v2 = vld [vmem:[%s2731_s12 + $0x34] ss:$80 sps:$4 sm:$0xff]   ;;  %v2455_v3 = vld [vmem:[%s2731_s12 + $0x3c] ss:$80 sps:$4 sm:$0xff]  }
  0x79   : > { %1528 = vmatprep.subr.bf16.mxu0 %v2362_v4  ;;  %1569 = vmatprep.subr.bf16.mxu1 %v2365_v5  ;;  %v2450_v4 = vld [vmem:[%s2731_s12 + $0x30] ss:$80 sps:$4 sm:$0xff]   ;;  %v2453_v5 = vld [vmem:[%s2731_s12 + $0x38] ss:$80 sps:$4 sm:$0xff]  }
  0x7b   : > { %1479 = vmatmul.mubr.bf16.vlgmr.msra.gmra.mxu0 %v2782_v36  ;;  %1520 = vmatmul.mubr.bf16.vlgmr.msra.gmra.mxu1 %v2782_v36 }
  0x7c   : > { %1529 = vmatpush1.bf16.msra.mxu0 %v2360_v6  ;;  %1570 = vmatpush1.bf16.msra.mxu1 %v2363_v7  ;;  %v2458_v6 = vld [vmem:[%s2731_s12 + $0x4a4] ss:$80 sps:$4 sm:$0xff]   ;;  %v2461_v7 = vld [vmem:[%s2731_s12 + $0x4ac] ss:$80 sps:$4 sm:$0xff]  }
  0x7d   : > { %1530 = vmatprep.subr.bf16.mxu0 %v2368_v8  ;;  %1571 = vmatprep.subr.bf16.mxu1 %v2371_v9  ;;  %v2456_v8 = vld [vmem:[%s2731_s12 + $0x4a0] ss:$80 sps:$4 sm:$0xff]   ;;  %v2459_v9 = vld [vmem:[%s2731_s12 + $0x4a8] ss:$80 sps:$4 sm:$0xff]  }
  0x7e   : > { %1560 = vmatprep.mubr.bf16.mxu0 %v2621_v0  ;;  %1601 = vmatprep.mubr.bf16.mxu1 %v2621_v0 }
  0x80   : > { %1531 = vmatpush1.bf16.msra.mxu0 %v2366_v10  ;;  %1572 = vmatpush1.bf16.msra.mxu1 %v2369_v11  ;;  %v2464_v10 = vld [vmem:[%s2731_s12 + $0x404] ss:$80 sps:$4 sm:$0xff]   ;;  %v2467_v11 = vld [vmem:[%s2731_s12 + $0x40c] ss:$80 sps:$4 sm:$0xff]  }
  0x81   : > { %1532 = vmatprep.subr.bf16.mxu0 %v2374_v12  ;;  %1573 = vmatprep.subr.bf16.mxu1 %v2377_v13  ;;  %v2462_v12 = vld [vmem:[%s2731_s12 + $0x400] ss:$80 sps:$4 sm:$0xff]   ;;  %v2465_v13 = vld [vmem:[%s2731_s12 + $0x408] ss:$80 sps:$4 sm:$0xff]  }
  0x84   : > { %1533 = vmatpush1.bf16.msra.mxu0 %v2372_v14  ;;  %1574 = vmatpush1.bf16.msra.mxu1 %v2375_v15  ;;  %v2470_v14 = vld [vmem:[%s2731_s12 + $0x364] ss:$80 sps:$4 sm:$0xff]   ;;  %v2473_v15 = vld [vmem:[%s2731_s12 + $0x36c] ss:$80 sps:$4 sm:$0xff]  }
  0x85   : > { %1534 = vmatprep.subr.bf16.mxu0 %v2380_v16  ;;  %1575 = vmatprep.subr.bf16.mxu1 %v2383_v17  ;;  %v2468_v16 = vld [vmem:[%s2731_s12 + $0x360] ss:$80 sps:$4 sm:$0xff]   ;;  %v2471_v17 = vld [vmem:[%s2731_s12 + $0x368] ss:$80 sps:$4 sm:$0xff]  }
  0x88   : > { %1535 = vmatpush1.bf16.msra.mxu0 %v2378_v18  ;;  %1576 = vmatpush1.bf16.msra.mxu1 %v2381_v19  ;;  %v2476_v18 = vld [vmem:[%s2731_s12 + $0x2c4] ss:$80 sps:$4 sm:$0xff]   ;;  %v2479_v19 = vld [vmem:[%s2731_s12 + $0x2cc] ss:$80 sps:$4 sm:$0xff]  }
  0x89   : > { %1536 = vmatprep.subr.bf16.mxu0 %v2386_v20  ;;  %1577 = vmatprep.subr.bf16.mxu1 %v2389_v21  ;;  %v2474_v20 = vld [vmem:[%s2731_s12 + $0x2c0] ss:$80 sps:$4 sm:$0xff]   ;;  %v2477_v21 = vld [vmem:[%s2731_s12 + $0x2c8] ss:$80 sps:$4 sm:$0xff]  }
  0x8c   : > { %1537 = vmatpush1.bf16.msra.mxu0 %v2384_v22  ;;  %1578 = vmatpush1.bf16.msra.mxu1 %v2387_v23  ;;  %v2485_v22 = vld [vmem:[%s2731_s12 + $0x22c] ss:$80 sps:$4 sm:$0xff]   ;;  %v2480_v23 = vld [vmem:[%s2731_s12 + $0x220] ss:$80 sps:$4 sm:$0xff]  }
  0x8d   : > { %1538 = vmatprep.subr.bf16.mxu0 %v2392_v24  ;;  %1579 = vmatprep.subr.bf16.mxu1 %v2395_v25  ;;  %v2483_v24 = vld [vmem:[%s2731_s12 + $0x228] ss:$80 sps:$4 sm:$0xff]   ;;  %v2488_v25 = vld [vmem:[%s2731_s12 + $0x184] ss:$80 sps:$4 sm:$0xff]  }
  0x90   : > { %1539 = vmatpush1.bf16.msra.mxu0 %v2390_v26  ;;  %1580 = vmatpush1.bf16.msra.mxu1 %v2393_v27  ;;  %v2491_v26 = vld [vmem:[%s2731_s12 + $0x18c] ss:$80 sps:$4 sm:$0xff]   ;;  %v2486_v27 = vld [vmem:[%s2731_s12 + $0x180] ss:$80 sps:$4 sm:$0xff]  }
  0x91   : > { %1540 = vmatprep.subr.bf16.mxu0 %v2398_v28  ;;  %1581 = vmatprep.subr.bf16.mxu1 %v2401_v29  ;;  %v2489_v28 = vld [vmem:[%s2731_s12 + $0x188] ss:$80 sps:$4 sm:$0xff]   ;;  %v2494_v29 = vld [vmem:[%s2731_s12 + $0xe4] ss:$80 sps:$4 sm:$0xff]  }
  0x94   : > { %1541 = vmatpush1.bf16.msra.mxu0 %v2396_v30  ;;  %1582 = vmatpush1.bf16.msra.mxu1 %v2399_v31  ;;  %v2497_v30 = vld [vmem:[%s2731_s12 + $0xec] ss:$80 sps:$4 sm:$0xff]   ;;  %v2492_v31 = vld [vmem:[%s2731_s12 + $0xe0] ss:$80 sps:$4 sm:$0xff]  }
  0x95   : > { %1542 = vmatprep.subr.bf16.mxu0 %v2404_v32  ;;  %1583 = vmatprep.subr.bf16.mxu1 %v2407_v33  ;;  %v2495_v32 = vld [vmem:[%s2731_s12 + $0xe8] ss:$80 sps:$4 sm:$0xff]   ;;  %v2500_v33 = vld [vmem:[%s2731_s12 + $0x44] ss:$80 sps:$4 sm:$0xff]  }
  0x98   : > { %1543 = vmatpush1.bf16.msra.mxu0 %v2402_v34  ;;  %1584 = vmatpush1.bf16.msra.mxu1 %v2405_v35  ;;  %v2503_v34 = vld [vmem:[%s2731_s12 + $0x4c] ss:$80 sps:$4 sm:$0xff]   ;;  %v2498_v35 = vld [vmem:[%s2731_s12 + $0x40] ss:$80 sps:$4 sm:$0xff]  }
  0x99   : > { %1610 = vmatprep.subr.bf16.mxu0 %v2410_v37  ;;  %1651 = vmatprep.subr.bf16.mxu1 %v2413_v38  ;;  %v2501_v37 = vld [vmem:[%s2731_s12 + $0x48] ss:$80 sps:$4 sm:$0xff]   ;;  %v464_v38 = vlaneseq }
  0x9b   : > { %1561 = vmatmul.mubr.bf16.vlgmr.msra.gmra.mxu0 %v2782_v36  ;;  %1602 = vmatmul.mubr.bf16.vlgmr.msra.gmra.mxu1 %v2782_v36 }
  0x9c   : > { %1611 = vmatpush1.bf16.msra.mxu0 %v2408_v39  ;;  %1652 = vmatpush1.bf16.msra.mxu1 %v2411_v40  ;;  %v2928_v39 = vshrl.u32 %v464_v38, 7 }
  0x9d   : > { %1612 = vmatprep.subr.bf16.mxu0 %v2416_v41  ;;  %1653 = vmatprep.subr.bf16.mxu1 %v2419_v42  ;;  %v458_v42 = vld [vmem:[%s2737_s30] sm:$0xff] }
  0x9e   : > { %1642 = vmatprep.mubr.bf16.mxu0 %v2621_v0  ;;  %1683 = vmatprep.mubr.bf16.mxu1 %v2621_v0  ;;  %v2932_v40 = vsub.s32 0, %v2928_v39  ;;  %v2935_v41 = vsub.s32 2, %v2928_v39 }
  0xa0   : > { %1613 = vmatpush1.bf16.msra.mxu0 %v2414_v43  ;;  %1654 = vmatpush1.bf16.msra.mxu1 %v2417_v44  ;;  %v2939_v43 = vsub.s32 1, %v2928_v39  ;;  %v2942_v44 = vsub.s32 3, %v2928_v39 }
  0xa1   : > { %1614 = vmatprep.subr.bf16.mxu0 %v2422_v45  ;;  %1655 = vmatprep.subr.bf16.mxu1 %v2425_v46  ;;  %v475_v45 = vrot.slane %v458_v42, %v2935_v41 }
  0xa2   : > { %v471_v46 = vrot.slane %v458_v42, %v2939_v43 }
  0xa4   : > { %1615 = vmatpush1.bf16.msra.mxu0 %v2420_v47  ;;  %1656 = vmatpush1.bf16.msra.mxu1 %v2423_v48  ;;  %v479_v47 = vrot.slane %v458_v42, %v2942_v44 }
  0xa5   : > { %1616 = vmatprep.subr.bf16.mxu0 %v2428_v49  ;;  %1657 = vmatprep.subr.bf16.mxu1 %v2431_v50 }
  0xa8   : > { %1617 = vmatpush1.bf16.msra.mxu0 %v2426_v51  ;;  %1658 = vmatpush1.bf16.msra.mxu1 %v2429_v52 }
  0xa9   : > { %1618 = vmatprep.subr.bf16.mxu0 %v2434_v53  ;;  %1659 = vmatprep.subr.bf16.mxu1 %v2437_v54 }
  0xac   : > { %1619 = vmatpush1.bf16.msra.mxu0 %v2432_v55  ;;  %1660 = vmatpush1.bf16.msra.mxu1 %v2435_v56 }
  0xad   : > { %1620 = vmatprep.subr.bf16.mxu0 %v2440_v57  ;;  %1661 = vmatprep.subr.bf16.mxu1 %v2443_v58 }
  0xb0   : > { %1621 = vmatpush1.bf16.msra.mxu0 %v2438_v59  ;;  %1662 = vmatpush1.bf16.msra.mxu1 %v2441_v60 }
  0xb1   : > { %1622 = vmatprep.subr.bf16.mxu0 %v2446_v61  ;;  %1663 = vmatprep.subr.bf16.mxu1 %v2449_v62  ;;  %v482_v62 = vsub.s32 4, %v2928_v39 }
  0xb4   : > { %1623 = vmatpush1.bf16.msra.mxu0 %v2444_v63  ;;  %1664 = vmatpush1.bf16.msra.mxu1 %v2447_v1  ;;  %v490_v63 = vsub.s32 6, %v2928_v39  ;;  %v486_v1 = vsub.s32 5, %v2928_v39 }
  0xb5   : > { %1624 = vmatprep.subr.bf16.mxu0 %v2452_v2  ;;  %1665 = vmatprep.subr.bf16.mxu1 %v2455_v3  ;;  %v494_v2 = vsub.s32 7, %v2928_v39  ;;  %v483_v3 = vrot.slane %v458_v42, %v482_v62 }
  0xb8   : > { %1625 = vmatpush1.bf16.msra.mxu0 %v2450_v4  ;;  %1666 = vmatpush1.bf16.msra.mxu1 %v2453_v5  ;;  %v491_v4 = vrot.slane %v458_v42, %v490_v63  ;;  %v487_v5 = vrot.slane %v458_v42, %v486_v1 }
  0xb9   : > { %1692 = vmatprep.subr.bf16.mxu0 %v2458_v6  ;;  %1733 = vmatprep.subr.bf16.mxu1 %v2461_v7  ;;  %v495_v6 = vrot.slane %v458_v42, %v494_v2 }
  0xbb   : > { %1643 = vmatmul.mubr.bf16.vlgmr.msra.gmra.mxu0 %v2782_v36  ;;  %1684 = vmatmul.mubr.bf16.vlgmr.msra.gmra.mxu1 %v2782_v36 }
  0xbc   : > { %1693 = vmatpush1.bf16.msra.mxu0 %v2456_v8  ;;  %1734 = vmatpush1.bf16.msra.mxu1 %v2459_v9 }
  0xbd   : > { %1694 = vmatprep.subr.bf16.mxu0 %v2464_v10  ;;  %1735 = vmatprep.subr.bf16.mxu1 %v2467_v11 }
  0xbe   : > { %1724 = vmatprep.mubr.bf16.mxu0 %v2621_v0  ;;  %1765 = vmatprep.mubr.bf16.mxu1 %v2621_v0  ;;  %v2482_v0 = vld [vmem:[%s2731_s12 + $0x224] ss:$80 sps:$4 sm:$0xff]  }
  0xc0   : > { %1695 = vmatpush1.bf16.msra.mxu0 %v2462_v12  ;;  %1736 = vmatpush1.bf16.msra.mxu1 %v2465_v13 }
  0xc1   : > { %1696 = vmatprep.subr.bf16.mxu0 %v2470_v14  ;;  %1737 = vmatprep.subr.bf16.mxu1 %v2473_v15 }
  0xc4   : > { %1697 = vmatpush1.bf16.msra.mxu0 %v2468_v16  ;;  %1738 = vmatpush1.bf16.msra.mxu1 %v2471_v17 }
  0xc5   : > { %1698 = vmatprep.subr.bf16.mxu0 %v2476_v18  ;;  %1739 = vmatprep.subr.bf16.mxu1 %v2479_v19 }
  0xc8   : > { %1699 = vmatpush1.bf16.msra.mxu0 %v2474_v20  ;;  %1740 = vmatpush1.bf16.msra.mxu1 %v2477_v21  ;;  %v459_v21 = vld [vmem:[%s2737_s30 + $0x8] sm:$0xff] }
  0xc9   : > { %1700 = vmatprep.subr.bf16.mxu0 %v2482_v0  ;;  %1741 = vmatprep.subr.bf16.mxu1 %v2485_v22  ;;  %v499_v0 = vrot.slane %v459_v21, %v2932_v40  ;;  %v507_v22 = vrot.slane %v459_v21, %v2935_v41 }
  0xcc   : > { %1701 = vmatpush1.bf16.msra.mxu0 %v2480_v23  ;;  %1742 = vmatpush1.bf16.msra.mxu1 %v2483_v24  ;;  %v503_v23 = vrot.slane %v459_v21, %v2939_v43  ;;  %v511_v24 = vrot.slane %v459_v21, %v2942_v44 }
  0xcd   : > { %1702 = vmatprep.subr.bf16.mxu0 %v2488_v25  ;;  %1743 = vmatprep.subr.bf16.mxu1 %v2491_v26 }
  0xd0   : > { %1703 = vmatpush1.bf16.msra.mxu0 %v2486_v27  ;;  %1744 = vmatpush1.bf16.msra.mxu1 %v2489_v28 }
  0xd1   : > { %1704 = vmatprep.subr.bf16.mxu0 %v2494_v29  ;;  %1745 = vmatprep.subr.bf16.mxu1 %v2497_v30 }
  0xd4   : > { %1705 = vmatpush1.bf16.msra.mxu0 %v2492_v31  ;;  %1746 = vmatpush1.bf16.msra.mxu1 %v2495_v32 }
  0xd5   : > { %1706 = vmatprep.subr.bf16.mxu0 %v2500_v33  ;;  %1747 = vmatprep.subr.bf16.mxu1 %v2503_v34 }
  0xd8   : > { %1707 = vmatpush1.bf16.msra.mxu0 %v2498_v35  ;;  %1748 = vmatpush1.bf16.msra.mxu1 %v2501_v37 }
  0xdb   : > { %1725 = vmatmul.mubr.bf16.vlgmr.msra.gmra.mxu0 %v2782_v36  ;;  %1766 = vmatmul.mubr.bf16.vlgmr.msra.gmra.mxu1 %v2782_v36  ;;  %v467_v36 = vrot.slane %v458_v42, %v2932_v40  ;;  %v515_v42 = vrot.slane %v459_v21, %v482_v62 }
 0x11b   : > { %v1398_v48 = vpop.f32.mrf.mxu0  ;;  %v1439_v49 = vpop.f32.mrf.mxu1 }
 0x11c   : > { %v1399_v50 = vadd.f32 %v1398_v48, %v467_v36  ;;  %v1440_v51 = vadd.f32 %v1439_v49, %v475_v45  ;;  %v523_v36 = vrot.slane %v459_v21, %v490_v63  ;;  %v519_v45 = vrot.slane %v459_v21, %v486_v1 }
 0x11d   : > { %v1400_v52 = vpop.f32.mrf.mxu0  ;;  %v1441_v53 = vpop.f32.mrf.mxu1 }
 0x11e   : > { %v1401_v54 = vadd.f32 %v1400_v52, %v471_v46  ;;  %v1442_v55 = vadd.f32 %v1441_v53, %v479_v47  ;;  %v527_v46 = vrot.slane %v459_v21, %v494_v2 }
 0x11f   : > { %v1402_v56 = vpop.f32.mrf.mxu0  ;;  %v1443_v57 = vpop.f32.mrf.mxu1 }
 0x120   : > { %v2186_v58 = vpack.c.bf16 %v1401_v54, %v1399_v50  ;;  %v2187_v59 = vpack.c.bf16 %v1442_v55, %v1440_v51 }
 0x121   : > { %v1403_v60 = vpop.f32.mrf.mxu0  ;;  %v1444_v61 = vpop.f32.mrf.mxu1 }
 0x122   : > { %1854 = vst [vmem:[%s2951_s28] sm:$0xff] %v2186_v58  ;;  %1855 = vst [vmem:[%s2951_s28 + $0x8] sm:$0xff] %v2187_v59  ;;  %v460_v61 = vld [vmem:[%s2737_s30 + $0x10] sm:$0xf] }
 0x123   : > { %v531_v62 = vrot.slane %v460_v61, %v2932_v40  ;;  %v539_v63 = vrot.slane %v460_v61, %v2935_v41  ;;  %v535_v1 = vrot.slane %v460_v61, %v2939_v43  ;;  %v543_v2 = vrot.slane %v460_v61, %v2942_v44 }
 0x13b   : > { %v1480_v7 = vpop.f32.mrf.mxu0  ;;  %v1521_v8 = vpop.f32.mrf.mxu1 }
 0x13c   : > { %v1481_v9 = vadd.f32 %v1480_v7, %v483_v3  ;;  %v1522_v10 = vadd.f32 %v1521_v8, %v491_v4 }
 0x13d   : > { %v1482_v11 = vpop.f32.mrf.mxu0  ;;  %v1523_v12 = vpop.f32.mrf.mxu1 }
 0x13e   : > { %v1483_v13 = vadd.f32 %v1482_v11, %v487_v5  ;;  %v1524_v14 = vadd.f32 %v1523_v12, %v495_v6 }
 0x13f   : > { %v1484_v15 = vpop.f32.mrf.mxu0  ;;  %v1525_v16 = vpop.f32.mrf.mxu1 }
 0x140   : > { %v2188_v17 = vpack.c.bf16 %v1483_v13, %v1481_v9  ;;  %v2189_v18 = vpack.c.bf16 %v1524_v14, %v1522_v10 }
 0x141   : > { %v1485_v19 = vpop.f32.mrf.mxu0  ;;  %v1526_v20 = vpop.f32.mrf.mxu1 }
 0x142   : > { %1856 = vst [vmem:[%s2951_s28 + $0x10] sm:$0xff] %v2188_v17  ;;  %1857 = vst [vmem:[%s2951_s28 + $0x18] sm:$0xff] %v2189_v18 }
 0x15b   : > { %v1562_v25 = vpop.f32.mrf.mxu0  ;;  %v1603_v26 = vpop.f32.mrf.mxu1 }
 0x15c   : > { %v1563_v27 = vadd.f32 %v1562_v25, %v499_v0  ;;  %v1604_v28 = vadd.f32 %v1603_v26, %v507_v22 }
 0x15d   : > { %v1564_v29 = vpop.f32.mrf.mxu0  ;;  %v1605_v30 = vpop.f32.mrf.mxu1 }
 0x15e   : > { %v1565_v31 = vadd.f32 %v1564_v29, %v503_v23  ;;  %v1606_v32 = vadd.f32 %v1605_v30, %v511_v24 }
 0x15f   : > { %v1566_v33 = vpop.f32.mrf.mxu0  ;;  %v1607_v34 = vpop.f32.mrf.mxu1 }
 0x160   : > { %v2190_v35 = vpack.c.bf16 %v1565_v31, %v1563_v27  ;;  %v2191_v37 = vpack.c.bf16 %v1606_v32, %v1604_v28 }
 0x161   : > { %v1567_v38 = vpop.f32.mrf.mxu0  ;;  %v1608_v39 = vpop.f32.mrf.mxu1 }
 0x162   : > { %1858 = vst [vmem:[%s2951_s28 + $0x20] sm:$0xff] %v2190_v35  ;;  %1859 = vst [vmem:[%s2951_s28 + $0x28] sm:$0xff] %v2191_v37 }
 0x17b   : > { %v1644_v47 = vpop.f32.mrf.mxu0  ;;  %v1685_v48 = vpop.f32.mrf.mxu1 }
 0x17c   : > { %v1645_v49 = vadd.f32 %v1644_v47, %v515_v42  ;;  %v1686_v50 = vadd.f32 %v1685_v48, %v523_v36 }
 0x17d   : > { %v1646_v51 = vpop.f32.mrf.mxu0  ;;  %v1687_v52 = vpop.f32.mrf.mxu1 }
 0x17e   : > { %v1647_v53 = vadd.f32 %v1646_v51, %v519_v45  ;;  %v1688_v54 = vadd.f32 %v1687_v52, %v527_v46 }
 0x17f   : > { %v1648_v55 = vpop.f32.mrf.mxu0  ;;  %v1689_v56 = vpop.f32.mrf.mxu1 }
 0x180   : > { %v2192_v57 = vpack.c.bf16 %v1647_v53, %v1645_v49  ;;  %v2193_v58 = vpack.c.bf16 %v1688_v54, %v1686_v50 }
 0x181   : > { %v1649_v59 = vpop.f32.mrf.mxu0  ;;  %v1690_v60 = vpop.f32.mrf.mxu1 }
 0x182   : > { %1860 = vst [vmem:[%s2951_s28 + $0x30] sm:$0xff] %v2192_v57  ;;  %1861 = vst [vmem:[%s2951_s28 + $0x38] sm:$0xff] %v2193_v58 }
 0x19b   : > { %v1726_v3 = vpop.f32.mrf.mxu0  ;;  %v1767_v4 = vpop.f32.mrf.mxu1 }
 0x19c   : > { %v1727_v7 = vadd.f32 %v1726_v3, %v531_v62  ;;  %v1768_v8 = vadd.f32 %v1767_v4, %v539_v63 }
 0x19d   : > { %v1728_v5 = vpop.f32.mrf.mxu0  ;;  %v1769_v6 = vpop.f32.mrf.mxu1 }
 0x19e   : > { %v1729_v9 = vadd.f32 %v1728_v5, %v535_v1  ;;  %v1770_v10 = vadd.f32 %v1769_v6, %v543_v2 }
 0x19f   : > { %v1730_v11 = vpop.f32.mrf.mxu0  ;;  %v1771_v12 = vpop.f32.mrf.mxu1 }
 0x1a0   : > { %v2194_v13 = vpack.c.bf16 %v1729_v9, %v1727_v7  ;;  %v2195_v40 = vpack.c.bf16 %v1770_v10, %v1768_v8 }
 0x1a1   : > { %v1731_v14 = vpop.f32.mrf.mxu0  ;;  %v1772_v41 = vpop.f32.mrf.mxu1 }
 0x1a2   : > { %1862 = vst [vmem:[%s2951_s28 + $0x40] sm:$0xff] %v2194_v13  ;;  %1863 = vst [vmem:[%s2951_s28 + $0x48] sm:$0xff] %v2195_v40 }
 0x1a3 PF: > { %s19_s17 = sadd.s32 1, %s2614_s17   ;;  %s3002_s12 = smov %s2598_s13 }
 0x1a4   : > { %p16_p9 = scmp.ge.s32.totalorder %s19_s17, 4   ;;  %s3003_s13 = smov %s2602_s14 }
 0x1a5   : > { %s3004_s14 = smov %s2687_s23  ;;  %s3005_s15 = smov %s2610_s16 }
 0x1a6   : > { %s3006_s16 = smov %s3008_s19  ;;  %18 = sbr.rel (!%p16_p9) target bundleno = 6 (0x6), region = 88 }
 0x1ab   :  { %1894 = vsyncpa [#allocation3], 1 }
 0x1ac   :  { %1896 = vsyncpa [#allocation3 + $0x1], 1 }
 0x1ad   :  { %1897 = vsyncpa [#allocation5], 1 }
 0x1ae   :  { %1899 = vsyncpa [#allocation5 + $0x1], 1 }

</bundles_post_ra>
